<compile_context>
chip_gen: v6e
topology: v6e:2x2x1
jax: 0.10.0
libtpu: 0.0.40
codegen_flags: <defaults>
</compile_context>

<pallas_src>
import functools

import jax
import jax.numpy as jnp
from jax.experimental import pallas as pl
from jax.experimental.pallas import tpu as pltpu


_DEFAULT_TB = 1024  # default batch tile (rows); sweep 512-2048 per generation


def _leaky_relu(x, slope=0.2):
    return jnp.where(x > 0, x, slope * x)


def _normalize_rows(y):
    # torch: y / max(||y||_2, 1e-12)  ==  y * rsqrt(max(sum(y^2), 1e-24))
    sumsq = jnp.sum(y * y, axis=1, keepdims=True)
    return y * jax.lax.rsqrt(jnp.maximum(sumsq, 1e-24))


def _projector_single_kernel(x_ref, w1_ref, b1_ref, o_ref):
    # x_ref: (tb, d_in), w1_ref: (d_in, d_out), b1_ref: (1, d_out)
    y = jnp.dot(x_ref[...], w1_ref[...], preferred_element_type=jnp.float32)
    y = _leaky_relu(y + b1_ref[...])
    o_ref[...] = _normalize_rows(y).astype(o_ref.dtype)


def _projector_double_kernel(x_ref, w1_ref, b1_ref, w2_ref, b2_ref, o_ref):
    # x_ref: (tb, d_in), w1: (d_in, d_mid), b1: (1, d_mid),
    # w2: (d_mid, d_out), b2: (1, d_out)
    h = jnp.dot(x_ref[...], w1_ref[...], preferred_element_type=jnp.float32)
    h = _leaky_relu(h + b1_ref[...])
    y = jnp.dot(h, w2_ref[...], preferred_element_type=jnp.float32)
    y = _leaky_relu(y + b2_ref[...])
    o_ref[...] = _normalize_rows(y).astype(o_ref.dtype)


def _pick_tile(N, block_batch):
    """Pick a batch tile: full-extent, or a multiple of 8 (f32 sublane rule)."""
    tb = _DEFAULT_TB if block_batch is None else int(block_batch)
    tb = min(tb, N)
    if tb < N:
        tb = max(8, (tb // 8) * 8)
    return tb


def _vmem_limit_bytes(tb, d_in, d_mid, d_out, itemsize=4):
    """Explicit scoped-VMEM budget: double-buffered x/out tiles + weights."""
    tiles = 2 * tb * (d_in + d_out) * itemsize              # in/out, 2 buffers
    weights = 2 * (d_in * d_mid + d_mid * d_out + d_mid + d_out) * itemsize
    need = tiles + weights
    # 4x headroom for internal scratch, clamped to stay inside v7x's 64 MiB.
    return int(min(max(4 * need, 16 * 2**20), 48 * 2**20))


@functools.partial(jax.jit, static_argnames=("block_batch",))
def projector_single(x, w1, b1, *, block_batch=None):
    N, d_in = x.shape
    d_out = w1.shape[1]
    tb = _pick_tile(N, block_batch)
    assert tb == N or tb % 8 == 0, "batch tile must equal N or be a multiple of 8"

    n_pad = pl.cdiv(N, tb) * tb
    xp = x if n_pad == N else jnp.pad(x, ((0, n_pad - N), (0, 0)))
    b1 = b1.reshape(1, d_out)

    out = pl.pallas_call(
        _projector_single_kernel,
        out_shape=jax.ShapeDtypeStruct((n_pad, d_out), x.dtype),
        grid_spec=pltpu.PrefetchScalarGridSpec(
            num_scalar_prefetch=0,
            grid=(n_pad // tb,),
            in_specs=[
                pl.BlockSpec((tb, d_in), lambda i: (i, 0)),
                pl.BlockSpec((d_in, d_out), lambda i: (0, 0)),
                pl.BlockSpec((1, d_out), lambda i: (0, 0)),
            ],
            out_specs=pl.BlockSpec((tb, d_out), lambda i: (i, 0)),
        ),
        compiler_params=pltpu.CompilerParams(
            dimension_semantics=("parallel",),
            vmem_limit_bytes=_vmem_limit_bytes(tb, d_in, d_out, d_out),
        ),
    )(xp, w1, b1)
    return out if n_pad == N else out[:N]


@functools.partial(jax.jit, static_argnames=("block_batch",))
def projector_double(x, w1, b1, w2, b2, *, block_batch=None):
    N, d_in = x.shape
    d_mid = w1.shape[1]
    d_out = w2.shape[1]
    tb = _pick_tile(N, block_batch)
    assert tb == N or tb % 8 == 0, "batch tile must equal N or be a multiple of 8"

    n_pad = pl.cdiv(N, tb) * tb
    xp = x if n_pad == N else jnp.pad(x, ((0, n_pad - N), (0, 0)))
    b1 = b1.reshape(1, d_mid)
    b2 = b2.reshape(1, d_out)

    out = pl.pallas_call(
        _projector_double_kernel,
        out_shape=jax.ShapeDtypeStruct((n_pad, d_out), x.dtype),
        grid_spec=pltpu.PrefetchScalarGridSpec(
            num_scalar_prefetch=0,
            grid=(n_pad // tb,),
            in_specs=[
                pl.BlockSpec((tb, d_in), lambda i: (i, 0)),
                pl.BlockSpec((d_in, d_mid), lambda i: (0, 0)),
                pl.BlockSpec((1, d_mid), lambda i: (0, 0)),
                pl.BlockSpec((d_mid, d_out), lambda i: (0, 0)),
                pl.BlockSpec((1, d_out), lambda i: (0, 0)),
            ],
            out_specs=pl.BlockSpec((tb, d_out), lambda i: (i, 0)),
        ),
        compiler_params=pltpu.CompilerParams(
            dimension_semantics=("parallel",),
            vmem_limit_bytes=_vmem_limit_bytes(tb, d_in, d_mid, d_out),
        ),
    )(xp, w1, b1, w2, b2)
    return out if n_pad == N else out[:N]


# ---- pure-JAX references (mirror PyTorch semantics exactly) ----
def _ref_single(x, w1, b1):
    y = jax.nn.leaky_relu(x @ w1 + b1, negative_slope=0.2)
    n = jnp.sqrt(jnp.sum(y * y, axis=1, keepdims=True))
    return y / jnp.maximum(n, 1e-12)


def _ref_double(x, w1, b1, w2, b2):
    h = jax.nn.leaky_relu(x @ w1 + b1, negative_slope=0.2)
    y = jax.nn.leaky_relu(h @ w2 + b2, negative_slope=0.2)
    n = jnp.sqrt(jnp.sum(y * y, axis=1, keepdims=True))
    return y / jnp.maximum(n, 1e-12)


if __name__ == "__main__":
    key = jax.random.PRNGKey(0)
    N, d_input, d_common = 8, 32, 16
    d_intermediate = (d_input + d_common) // 2  # 24, as in the 'double' branch

    k_x, k_w1, k_b1, k_w2, k_b2, k_ws, k_bs, k_x2 = jax.random.split(key, 8)
    x = jax.random.normal(k_x, (N, d_input), dtype=jnp.float32)

    # nn.init.normal_(std=0.01) on weights / biases; stored as [in, out]
    w1 = 0.01 * jax.random.normal(k_w1, (d_input, d_intermediate), jnp.float32)
    b1 = 0.01 * jax.random.normal(k_b1, (d_intermediate,), jnp.float32)
    w2 = 0.01 * jax.random.normal(k_w2, (d_intermediate, d_common), jnp.float32)
    b2 = 0.01 * jax.random.normal(k_b2, (d_common,), jnp.float32)

    ws = 0.01 * jax.random.normal(k_ws, (d_input, d_common), jnp.float32)
    bs = 0.01 * jax.random.normal(k_bs, (d_common,), jnp.float32)

    # 'double' projector, small batch (single grid step, full-extent tile)
    out_d = projector_double(x, w1, b1, w2, b2)
    jax.block_until_ready(out_d)
    ref_d = _ref_double(x, w1, b1, w2, b2)
    assert jnp.allclose(out_d, ref_d, atol=1e-5, rtol=1e-5), "double mismatch"

    # 'single' projector, small batch
    out_s = projector_single(x, ws, bs)
    jax.block_until_ready(out_s)
    ref_s = _ref_single(x, ws, bs)
    assert jnp.allclose(out_s, ref_s, atol=1e-5, rtol=1e-5), "single mismatch"

    # Larger, non-tile-multiple batch to exercise the pipelined grid + padding.
    N2 = 1000
    x2 = jax.random.normal(k_x2, (N2, d_input), dtype=jnp.float32)

    out_d2 = projector_double(x2, w1, b1, w2, b2, block_batch=512)
    jax.block_until_ready(out_d2)
    ref_d2 = _ref_double(x2, w1, b1, w2, b2)
    assert jnp.allclose(out_d2, ref_d2, atol=1e-5, rtol=1e-5), "double (tiled) mismatch"

    out_s2 = projector_single(x2, ws, bs, block_batch=512)
    jax.block_until_ready(out_s2)
    ref_s2 = _ref_single(x2, ws, bs)
    assert jnp.allclose(out_s2, ref_s2, atol=1e-5, rtol=1e-5), "single (tiled) mismatch"

    print("KERNEL_OK")
</pallas_src>

<mosaic_0001>
module attributes {stable_mosaic.version = 11 : i64} {
  func.func @_projector_double_kernel(%arg0: i32, %arg1: memref<8x32xf32, #tpu.memory_space<vmem>>, %arg2: memref<32x24xf32, #tpu.memory_space<vmem>>, %arg3: memref<1x24xf32, #tpu.memory_space<vmem>>, %arg4: memref<24x16xf32, #tpu.memory_space<vmem>>, %arg5: memref<1x16xf32, #tpu.memory_space<vmem>>, %arg6: memref<8x16xf32, #tpu.memory_space<vmem>>) attributes {dimension_semantics = [#tpu.dimension_semantics<parallel>], iteration_bounds = array<i64: 1>, scalar_prefetch = 0 : i64, scratch_operands = 0 : i64, tpu.core_type = #tpu.core_type<tc>, window_params = [{transform_indices = @transform_0, window_bounds = array<i64: 8, 32>}, {pipeline_mode = #tpu.pipeline_mode<synchronous>, transform_indices = @transform_1, window_bounds = array<i64: 32, 24>}, {pipeline_mode = #tpu.pipeline_mode<synchronous>, transform_indices = @transform_2, window_bounds = array<i64: 1, 24>}, {pipeline_mode = #tpu.pipeline_mode<synchronous>, transform_indices = @transform_3, window_bounds = array<i64: 24, 16>}, {pipeline_mode = #tpu.pipeline_mode<synchronous>, transform_indices = @transform_4, window_bounds = array<i64: 1, 16>}, {transform_indices = @transform_5, window_bounds = array<i64: 8, 16>}]} {
    %c0 = arith.constant 0 : index
    %c0_0 = arith.constant 0 : index
    %0 = vector.load %arg1[%c0, %c0_0] : memref<8x32xf32, #tpu.memory_space<vmem>>, vector<8x32xf32>
    %c0_1 = arith.constant 0 : index
    %c0_2 = arith.constant 0 : index
    %1 = vector.load %arg2[%c0_1, %c0_2] : memref<32x24xf32, #tpu.memory_space<vmem>>, vector<32x24xf32>
    %cst = arith.constant dense<0.000000e+00> : vector<8x24xf32>
    %2 = tpu.matmul %0, %1, %cst {dimension_numbers = #tpu.dot_dimension_numbers<[1], [0], [0], [1], [0, 0, 1, 1], [], []>} : vector<8x32xf32>, vector<32x24xf32>, vector<8x24xf32> -> vector<8x24xf32>
    %c0_3 = arith.constant 0 : index
    %c0_4 = arith.constant 0 : index
    %3 = vector.load %arg3[%c0_3, %c0_4] : memref<1x24xf32, #tpu.memory_space<vmem>>, vector<1x24xf32>
    %4 = vector.broadcast %3 : vector<1x24xf32> to vector<8x24xf32>
    %5 = arith.addf %2, %4 : vector<8x24xf32>
    %cst_5 = arith.constant 0.000000e+00 : f32
    %6 = vector.broadcast %cst_5 : f32 to vector<8x24xf32>
    %7 = arith.cmpf ogt, %5, %6 : vector<8x24xf32>
    %cst_6 = arith.constant 2.000000e-01 : f32
    %8 = vector.broadcast %cst_6 : f32 to vector<8x24xf32>
    %9 = arith.mulf %8, %5 : vector<8x24xf32>
    %10 = arith.select %7, %5, %9 : vector<8x24xi1>, vector<8x24xf32>
    %c0_7 = arith.constant 0 : index
    %c0_8 = arith.constant 0 : index
    %11 = vector.load %arg4[%c0_7, %c0_8] : memref<24x16xf32, #tpu.memory_space<vmem>>, vector<24x16xf32>
    %cst_9 = arith.constant dense<0.000000e+00> : vector<8x16xf32>
    %12 = tpu.matmul %10, %11, %cst_9 {dimension_numbers = #tpu.dot_dimension_numbers<[1], [0], [0], [1], [0, 0, 1, 1], [], []>} : vector<8x24xf32>, vector<24x16xf32>, vector<8x16xf32> -> vector<8x16xf32>
    %c0_10 = arith.constant 0 : index
    %c0_11 = arith.constant 0 : index
    %13 = vector.load %arg5[%c0_10, %c0_11] : memref<1x16xf32, #tpu.memory_space<vmem>>, vector<1x16xf32>
    %14 = vector.broadcast %13 : vector<1x16xf32> to vector<8x16xf32>
    %15 = arith.addf %12, %14 : vector<8x16xf32>
    %cst_12 = arith.constant 0.000000e+00 : f32
    %16 = vector.broadcast %cst_12 : f32 to vector<8x16xf32>
    %17 = arith.cmpf ogt, %15, %16 : vector<8x16xf32>
    %cst_13 = arith.constant 2.000000e-01 : f32
    %18 = vector.broadcast %cst_13 : f32 to vector<8x16xf32>
    %19 = arith.mulf %18, %15 : vector<8x16xf32>
    %20 = arith.select %17, %15, %19 : vector<8x16xi1>, vector<8x16xf32>
    %21 = arith.mulf %20, %20 : vector<8x16xf32>
    %cst_14 = arith.constant dense<0.000000e+00> : vector<8xf32>
    %22 = vector.multi_reduction <add>, %21, %cst_14 [1] : vector<8x16xf32> to vector<8xf32>
    %23 = vector.shape_cast %22 : vector<8xf32> to vector<8x1xf32>
    %cst_15 = arith.constant 1.000000e-24 : f32
    %24 = vector.broadcast %cst_15 : f32 to vector<8x1xf32>
    %25 = arith.maximumf %23, %24 : vector<8x1xf32>
    %26 = math.rsqrt %25 : vector<8x1xf32>
    %27 = vector.broadcast %26 : vector<8x1xf32> to vector<8x16xf32>
    %28 = arith.mulf %20, %27 : vector<8x16xf32>
    %c0_16 = arith.constant 0 : index
    %c0_17 = arith.constant 0 : index
    %29 = vector.load %arg6[%c0_16, %c0_17] : memref<8x16xf32, #tpu.memory_space<vmem>>, vector<8x16xf32>
    tpu.vector_store %arg6[%c0_16, %c0_17], %28 {strides = array<i32>} : memref<8x16xf32, #tpu.memory_space<vmem>>, vector<8x16xf32>,
    return
  }
  func.func @transform_0(%arg0: i32) -> (i32, i32) {
    %c0_i32 = arith.constant 0 : i32
    %c0_i32_0 = arith.constant 0 : i32
    return %arg0, %c0_i32 : i32, i32
  }
  func.func @transform_1(%arg0: i32) -> (i32, i32) {
    %c0_i32 = arith.constant 0 : i32
    %c0_i32_0 = arith.constant 0 : i32
    %c0_i32_1 = arith.constant 0 : i32
    return %c0_i32, %c0_i32_0 : i32, i32
  }
  func.func @transform_2(%arg0: i32) -> (i32, i32) {
    %c0_i32 = arith.constant 0 : i32
    %c0_i32_0 = arith.constant 0 : i32
    %c0_i32_1 = arith.constant 0 : i32
    return %c0_i32, %c0_i32_0 : i32, i32
  }
  func.func @transform_3(%arg0: i32) -> (i32, i32) {
    %c0_i32 = arith.constant 0 : i32
    %c0_i32_0 = arith.constant 0 : i32
    %c0_i32_1 = arith.constant 0 : i32
    return %c0_i32, %c0_i32_0 : i32, i32
  }
  func.func @transform_4(%arg0: i32) -> (i32, i32) {
    %c0_i32 = arith.constant 0 : i32
    %c0_i32_0 = arith.constant 0 : i32
    %c0_i32_1 = arith.constant 0 : i32
    return %c0_i32, %c0_i32_0 : i32, i32
  }
  func.func @transform_5(%arg0: i32) -> (i32, i32) {
    %c0_i32 = arith.constant 0 : i32
    %c0_i32_0 = arith.constant 0 : i32
    return %arg0, %c0_i32 : i32, i32
  }
}

</mosaic_0001>

<bundles_post_ra>
// kernel: projector_double.1
= control target key start
LH: loop header
LB: loop body
LE: loop exit
PB: predicated region body
PF: predicated region fallthrough
CT: control target
= control target key end

     0   :  { %v280_v1 = vmov 0.0   ;;  %vm281_vm0 = vmmov 0   ;;  %s346_s0 = inlined_call_operand.vmem [shape: f32[8,32], index: 0, kind: input, shape index: {}]   ;;  %s347_s1 = inlined_call_operand.vmem [shape: f32[32,24], index: 1, kind: input, shape index: {}]   ;;  %s348_s2 = inlined_call_operand.vmem [shape: f32[1,24], index: 2, kind: input, shape index: {}]   ;;  %s349_s3 = inlined_call_operand.vmem [shape: f32[24,16], index: 3, kind: input, shape index: {}]   ;;  %s350_s4 = inlined_call_operand.vmem [shape: f32[1,16], index: 4, kind: input, shape index: {}]   ;;  %s351_s5 = inlined_call_operand.hbm [shape: f32[8,16], index: 5, kind: output, shape index: {}]  }
   0x1   :  { %v25_v0 = vld [vmem:[%s347_s1 + $0x18] sm:$0xff]  ;;  %233 = vmatprep.subr.mxu0 %v280_v1  ;;  %v24_v2 = vld [vmem:[%s347_s1 + $0x10] sm:$0xff]  ;;  %241 = vmatprep.mubr.msk.f32.mxu0 %vm281_vm0, %v280_v1 }
   0x2   :  { %234 = vmatpush3.msra.mxu0 %v25_v0  ;;  %244 = vmatprep.subr.mxu1 %v280_v1 }
   0x3   :  { %10 = vsyncpa [#allocation3], 0  ;;  %235 = vmatprep.subr.mxu0 %v280_v1  ;;  %v23_v3 = vld [vmem:[%s347_s1 + $0x8] sm:$0xff]  ;;  %250 = vmatprep.mubr.msk.f32.mxu1 %vm281_vm0, %v280_v1  ;;  %v22_v4 = vld [vmem:[%s347_s1] sm:$0xff]  ;;  %vm33_vm1 = vcmask 261120   ;;  %vm120_vm3 = vcmask 195584  }
   0x4   :  { %236 = vmatpush3.msra.mxu0 %v24_v2  ;;  %v21_v5 = vld [vmem:[%s346_s0] sm:$0xff]  ;;  %v112_v6 = vld [vmem:[%s349_s3 + $0x10] sm:$0xff]  ;;  %v111_v7 = vld [vmem:[%s349_s3 + $0x8] sm:$0xff]  ;;  %vm198_vm5 = vcmask 130048  }
   0x5   :  { %237 = vmatprep.subr.mxu0 %v280_v1  ;;  %245 = vmatpush3.msra.mxu1 %v112_v6  ;;  %v110_v8 = vld [vmem:[%s349_s3] sm:$0xff] }
   0x6   :  { %238 = vmatpush3.msra.mxu0 %v23_v3  ;;  %246 = vmatprep.subr.mxu1 %v280_v1  ;;  %v220_v9 = vld [vmem:[%s348_s2] ss:$0 sm:$0xff]  ;;  %s282_s2 = smov [#allocation2]  }
   0x7   :  { %239 = vmatprep.subr.mxu0 %v280_v1  ;;  %247 = vmatpush3.msra.mxu1 %v111_v7  ;;  %v222_v15 = vld [vmem:[%s350_s4] ss:$0 sm:$0xff]  ;;  %s212_s3 = sshll.u32 %s282_s2, 4  ;;  %s213_s3 = int_to_ptr.vmem [resolvable:$true] %s212_s3 }
   0x8   :  { %240 = vmatpush3.msra.mxu0 %v22_v4  ;;  %248 = vmatprep.subr.mxu1 %v280_v1  ;;  %s258_s4 = scalar_lea.vmem %s213_s3, 128  ;;  %p263_p1 = scmp.lt.s32.totalorder %s213_s3, %s213_s3 }
   0x9   :  { %242 = vmatmul.mubr.msk.f32.vlgmr.msra.gmra.mxu0 %vm33_vm1, %v21_v5  ;;  %249 = vmatpush3.msra.mxu1 %v110_v8  ;;  %p259_p0 = scmp.ne.s32.totalorder %s213_s3, %s258_s4  ;;  %p264_p2 = scmp.lt.s32.totalorder %s258_s4, %s258_s4 }
   0xb   :  { %p265_p3 = por %p264_p2, %p263_p1 }
   0xd   :  { %p266_p4 = pnand %p265_p3, %p259_p0 }
  0xc9   :  { %v103_v10 = vpop.f32.mrf.mxu0 }
  0xca   :  { %v104_v11 = vadd.f32 %v220_v9, %v103_v10 }
  0xcb   :  { %v243_v12 = vpop.f32.mrf.mxu0 }
  0xcc   :  { %vm107_vm2 = vcmp.gt.f32.partialorder %v104_v11, 0.0  ;;  %v108_v13 = vmul.f32 0.2, %v104_v11 }
  0xce   :  { %v109_v14 = vsel %vm107_vm2, %v104_v11, %v108_v13 }
  0xcf   :  { %251 = vmatmul.mubr.msk.f32.vlgmr.msra.gmra.mxu1 %vm120_vm3, %v109_v14 }
 0x18f   :  { %v190_v16 = vpop.f32.mrf.mxu1 }
 0x190   :  { %v191_v17 = vadd.f32 %v222_v15, %v190_v16 }
 0x191   :  { %v252_v18 = vpop.f32.mrf.mxu1 }
 0x192   :  { %v195_v19 = vmul.f32 0.2, %v191_v17  ;;  %vm194_vm4 = vcmp.gt.f32.partialorder %v191_v17, 0.0 }
 0x194   :  { %v196_v20 = vsel %vm194_vm4, %v191_v17, %v195_v19 }
 0x195   :  { %v197_v21 = vmul.f32 %v196_v20, %v196_v20 }
 0x197   :  { %v199_v22 = vsel %vm198_vm5, %v197_v21, 0.0 }
 0x198   :  { %200 = vadd.xlane.f32.xlu0 %v199_v22 }
 0x221   :  { %v201_v23 = vpop.xlane.xlu0 %200 }
 0x222   :  { %v202_v24 = vmax.f32 %v201_v23, 1e-24 }
 0x224   :  { %256 = vrsqrt.f32 %v202_v24 }
 0x231   :  { %v257_v25 = vpop.eup %256 }
 0x232   :  { %v204_v26 = vmul.f32 %v257_v25, %v196_v20 }
 0x234   :  { %205 = vst.msk [vmem:[#allocation2] sm:$0xff] %vm198_vm5, %v204_v26 }
 0x235   :  { %269 = shalt.err (!%p266_p4)
}
 0x236   :  { %215 = dma.vmem_to_hbm [thread:$0]  %s213_s3, 128, %s351_s5, [#allocation3]  }
 0x237   :  { %278 = dma.done.wait [#allocation3], 128  }
 0x238   :  { %279 = vsyncadd [#allocation3], 4294967168 }
 0x239   :  { %219 = vsyncpa [#allocation3], 1 }

</bundles_post_ra>
